<compile_context>
chip_gen: v6e
topology: v6e:2x2x1
jax: 0.10.0
libtpu: 0.0.40
codegen_flags: <defaults>
</compile_context>

<pallas_src>
import functools
from types import SimpleNamespace

import jax
import jax.numpy as jnp
from jax import lax
from jax.experimental import pallas as pl
from jax.experimental.pallas import tpu as pltpu


def _round_up(x, m):
    return (x + m - 1) // m * m


# --------------------------- focal loss (tiled) ------------------------------

_FOCAL_BLOCK_BYTES = 2 * 1024 * 1024      # per-input block budget (v7x-safe)


def _focal_kernel(logit_ref, gt_ref, out_ref, *, rows_valid, row_tile, need_mask):
    x = logit_ref[...]                                        # (row_tile, HW) f32
    g = gt_ref[...]
    pred = jnp.clip(jax.nn.sigmoid(x), 1e-4, 1.0 - 1e-4)      # torch _sigmoid()
    pos = (g == 1.0).astype(jnp.float32)
    neg = (g < 1.0).astype(jnp.float32)
    if need_mask:                                             # tail-row padding mask
        row = lax.broadcasted_iota(jnp.int32, x.shape, 0) + pl.program_id(0) * row_tile
        valid = (row < rows_valid).astype(jnp.float32)
        pos = pos * valid
        neg = neg * valid
    pos_loss = jnp.log(pred) * (1.0 - pred) ** 2 * pos
    neg_loss = jnp.log(1.0 - pred) * pred * pred * (1.0 - g) ** 4 * neg
    # Lane-dense per-lane partial sums; cross-lane reduce is finished in JAX.
    out_ref[0, 0, :] = jnp.sum(pos_loss, axis=0)
    out_ref[0, 1, :] = jnp.sum(neg_loss, axis=0)
    out_ref[0, 2, :] = jnp.sum(pos, axis=0)


def focal_loss(logits_nchw, gt_nchw):
    """CenterNet FocalLoss (_neg_loss) with torch _sigmoid fused in, tiled."""
    B, C, H, W = logits_nchw.shape
    HW, BC = H * W, B * C
    lg = logits_nchw.reshape(BC, HW).astype(jnp.float32)
    gt = gt_nchw.reshape(BC, HW).astype(jnp.float32)

    rows_p = _round_up(BC, 8)
    if rows_p != BC:
        lg = jnp.pad(lg, ((0, rows_p - BC), (0, 0)))
        gt = jnp.pad(gt, ((0, rows_p - BC), (0, 0)))

    # Largest sublane tile (multiple of 8) dividing rows_p under the VMEM budget.
    row_cap = max(8, min(512, rows_p, (_FOCAL_BLOCK_BYTES // (HW * 4)) // 8 * 8))
    row_tile = 8
    for t in range(8, row_cap + 1, 8):
        if rows_p % t == 0:
            row_tile = t
    grid = rows_p // row_tile

    kern = functools.partial(_focal_kernel, rows_valid=BC, row_tile=row_tile,
                             need_mask=(rows_p != BC))
    partials = pl.pallas_call(
        kern,
        out_shape=jax.ShapeDtypeStruct((grid, 3, HW), jnp.float32),
        grid=(grid,),
        in_specs=[pl.BlockSpec((row_tile, HW), lambda s: (s, 0)),
                  pl.BlockSpec((row_tile, HW), lambda s: (s, 0))],
        out_specs=pl.BlockSpec((1, 3, HW), lambda s: (s, 0, 0)),
        compiler_params=pltpu.CompilerParams(dimension_semantics=("parallel",)),
    )(lg, gt)

    sums = jnp.sum(partials, axis=(0, 2))                     # (3,)
    pos_s, neg_s, num_pos = sums[0], sums[1], sums[2]
    return jnp.where(num_pos == 0, -neg_s, -(pos_s + neg_s) / num_pos)


# ------------------- DMA-gather + masked-L1 (shared by all heads) ------------

_GATHER_CHUNK = 32   # objects gathered per grid step (multiple of 8)


def _gather_l1_kernel(ind_ref,        # SMEM (BKp,) int32  (scalar prefetch)
                      feat_hbm,       # ANY  (BHW, 1, C)   (stays in HBM)
                      mask_ref,       # VMEM (G, C)
                      tgt_ref,        # VMEM (G, C)
                      pred_ref,       # out  (G, C) block of (BKp, C)
                      acc_ref,        # out  (G, C) resident |diff| accumulator
                      row_buf,        # scratch VMEM (G, C)
                      sem):           # scratch DMA sems (G,)
    step = pl.program_id(0)
    G = row_buf.shape[0]
    base = step * G

    # True index gather: one small async row copy per object, all in flight at once.
    for j in range(G):
        pltpu.make_async_copy(feat_hbm.at[ind_ref[base + j]],       # (1, C) HBM row
                              row_buf.at[pl.ds(j, 1), :],
                              sem.at[j]).start()
    for j in range(G):
        pltpu.make_async_copy(feat_hbm.at[0], row_buf.at[pl.ds(j, 1), :],
                              sem.at[j]).wait()

    pred = row_buf[...]
    m = mask_ref[...]
    pred_ref[...] = pred

    @pl.when(step == 0)
    def _():
        acc_ref[...] = jnp.zeros_like(acc_ref)

    acc_ref[...] += jnp.abs(pred * m - tgt_ref[...] * m)


def _gather_masked_l1(feat2d, ind_flat, mask2d, tgt2d):
    """Gather rows of feat2d at ind_flat via per-row DMA.

    Returns (pred (BK, C) gathered rows, (C,) per-channel sums of |pred*m - tgt*m|).
    """
    BHW, C = feat2d.shape
    BK = ind_flat.shape[0]
    G = min(_GATHER_CHUNK, _round_up(BK, 8))
    BKp = _round_up(BK, G)
    if BKp != BK:
        pad = BKp - BK
        ind_flat = jnp.pad(ind_flat, (0, pad))           # padded objs gather row 0,
        mask2d = jnp.pad(mask2d, ((0, pad), (0, 0)))     # mask=0 -> contribute nothing
        tgt2d = jnp.pad(tgt2d, ((0, pad), (0, 0)))
    grid = BKp // G
    feat3 = feat2d.reshape(BHW, 1, C)                    # rows as (1, C) DMA tiles

    pred, acc = pl.pallas_call(
        _gather_l1_kernel,
        out_shape=(jax.ShapeDtypeStruct((BKp, C), jnp.float32),
                   jax.ShapeDtypeStruct((G, C), jnp.float32)),
        grid_spec=pltpu.PrefetchScalarGridSpec(
            num_scalar_prefetch=1,
            grid=(grid,),
            in_specs=[pl.BlockSpec(memory_space=pl.ANY),            # feat stays in HBM
                      pl.BlockSpec((G, C), lambda s, ind: (s, 0)),
                      pl.BlockSpec((G, C), lambda s, ind: (s, 0))],
            out_specs=(pl.BlockSpec((G, C), lambda s, ind: (s, 0)),
                       pl.BlockSpec((G, C), lambda s, ind: (0, 0))),  # resident acc
            scratch_shapes=[pltpu.VMEM((G, C), jnp.float32),
                            pltpu.SemaphoreType.DMA((G,))]),
        compiler_params=pltpu.CompilerParams(dimension_semantics=("arbitrary",)),
    )(ind_flat.astype(jnp.int32), feat3,
      mask2d.astype(jnp.float32), tgt2d.astype(jnp.float32))
    return pred[:BK], jnp.sum(acc, axis=0)


def _channels_last_2d(x_nchw):
    B, C, H, W = x_nchw.shape
    f = jnp.transpose(x_nchw, (0, 2, 3, 1)).reshape(B * H * W, C).astype(jnp.float32)
    return f, H * W


def _flat_ind(ind, HW):
    B = ind.shape[0]
    off = (jnp.arange(B, dtype=jnp.int32) * HW)[:, None]
    return (ind.astype(jnp.int32) + off).reshape(-1)


def reg_l1_loss(output_head, mask, ind, target):
    """RegL1Loss (2-D mask expanded over channels); used for the hp_offset head."""
    feat2d, HW = _channels_last_2d(output_head)
    C = feat2d.shape[1]
    tgt = target.astype(jnp.float32).reshape(-1, C)
    m = jnp.broadcast_to(mask.astype(jnp.float32)[:, :, None], target.shape).reshape(-1, C)
    _, colsum = _gather_masked_l1(feat2d, _flat_ind(ind, HW), m, tgt)
    return jnp.sum(colsum) / (jnp.sum(m) + 1e-4)


# --------------------------- BinRot glue (tiny, plain JAX) --------------------

def _compute_rot_loss(pred8, rot_mask, rotbin, rotres):
    tb = rotbin.reshape(-1, 2).astype(jnp.int32)
    tr = rotres.reshape(-1, 2).astype(jnp.float32)
    m = rot_mask.reshape(-1, 1).astype(jnp.float32)

    def bin_loss(logits, target):           # F.cross_entropy(output*mask, target, mean)
        logits = logits * m
        logp = jax.nn.log_softmax(logits, axis=-1)
        nll = -jnp.take_along_axis(logp, target[:, None], axis=1)[:, 0]
        return jnp.mean(nll)

    def smooth_l1(a, b):                    # F.smooth_l1_loss, beta=1
        d = jnp.abs(a - b)
        return jnp.where(d < 1.0, 0.5 * d * d, d - 0.5)

    loss_bin1 = bin_loss(pred8[:, 0:2], tb[:, 0])
    loss_bin2 = bin_loss(pred8[:, 4:6], tb[:, 1])

    sel1 = (tb[:, 0] != 0).astype(jnp.float32)
    n1 = jnp.sum(sel1)
    sin1 = jnp.sum(smooth_l1(pred8[:, 2], jnp.sin(tr[:, 0])) * sel1) / jnp.maximum(n1, 1.0)
    cos1 = jnp.sum(smooth_l1(pred8[:, 3], jnp.cos(tr[:, 0])) * sel1) / jnp.maximum(n1, 1.0)
    res1 = jnp.where(n1 > 0, sin1 + cos1, 0.0)

    sel2 = (tb[:, 1] != 0).astype(jnp.float32)
    n2 = jnp.sum(sel2)
    sin2 = jnp.sum(smooth_l1(pred8[:, 6], jnp.sin(tr[:, 1])) * sel2) / jnp.maximum(n2, 1.0)
    cos2 = jnp.sum(smooth_l1(pred8[:, 7], jnp.cos(tr[:, 1])) * sel2) / jnp.maximum(n2, 1.0)
    res2 = jnp.where(n2 > 0, sin2 + cos2, 0.0)

    return loss_bin1 + loss_bin2 + res1 + res2


# ------------- all heads sharing batch['ind'] -> ONE gather pallas_call -------

def _fused_ind_losses(opt, output, batch):
    f32 = jnp.float32
    B, K = batch['ind'].shape
    rm = batch['reg_mask'].astype(f32)[:, :, None]

    names = ['hps']
    if opt.wh_weight > 0:
        names.append('wh')
    if opt.dim_weight > 0:
        names += ['dim', 'p3d']
    if opt.reg_offset and opt.off_weight > 0:
        names.append('reg')
    use_rot = opt.rot_weight > 0
    all_names = names + (['rot'] if use_rot else [])

    sizes = {n: output[n].shape[1] for n in all_names}
    offs, o = {}, 0
    for n in all_names:
        offs[n] = (o, o + sizes[n])
        o += sizes[n]

    # One NCHW concat + ONE channels-last relayout for every ind-sharing head.
    cat = jnp.concatenate([output[n] for n in all_names], axis=1)
    feat2d, HW = _channels_last_2d(cat)

    def head_mask(n):
        if n == 'hps':
            return batch['hps_mask'].astype(f32)
        if n == 'rot':
            return jnp.zeros((B, K, sizes[n]), f32)     # rot is gather-only
        return jnp.broadcast_to(rm, (B, K, sizes[n]))   # RegL1Loss mask expand

    def head_tgt(n):
        if n == 'rot':
            return jnp.zeros((B, K, sizes[n]), f32)
        return batch[n].astype(f32)

    mask2d = jnp.concatenate([head_mask(n) for n in all_names], axis=2).reshape(B * K, -1)
    tgt2d = jnp.concatenate([head_tgt(n) for n in all_names], axis=2).reshape(B * K, -1)

    pred, colsum = _gather_masked_l1(feat2d, _flat_ind(batch['ind'], HW), mask2d, tgt2d)

    def numer(n):
        lo, hi = offs[n]
        return jnp.sum(colsum[lo:hi])

    reg_mask_sum = jnp.sum(batch['reg_mask'].astype(f32))
    # TODO(synk): KM3D's depth-based re-weighting of the hps loss (uses batch['dep'])
    # is not in the provided source; standard RegWeightedL1Loss semantics are used.
    losses = {'hp_loss': numer('hps') / (jnp.sum(batch['hps_mask'].astype(f32)) + 1e-4)}
    if 'wh' in offs:
        losses['wh_loss'] = numer('wh') / (sizes['wh'] * reg_mask_sum + 1e-4)
    if 'dim' in offs:
        losses['dim_loss'] = numer('dim') / (sizes['dim'] * reg_mask_sum + 1e-4)
    if 'p3d' in offs:
        losses['p3d_loss'] = numer('p3d') / (sizes['p3d'] * reg_mask_sum + 1e-4)
    if 'reg' in offs:
        losses['off_loss'] = numer('reg') / (sizes['reg'] * reg_mask_sum + 1e-4)
    if use_rot:
        lo, hi = offs['rot']
        losses['rot_loss'] = _compute_rot_loss(pred[:, lo:hi], batch['rot_mask'],
                                               batch['rotbin'], batch['rotres'])
    return losses


# ----------------------------- AutoShapeLoss.forward --------------------------

def autoshape_loss_forward(opt, outputs, batch, phase=None):
    del phase
    zero = jnp.float32(0.0)
    hp_offset_loss = hm_hp_loss = zero
    prob_loss = coor_loss = box_score = zero

    output = outputs[0]

    # hm / hm_hp focal losses (_sigmoid fused into the tiled kernel).
    hm_loss = focal_loss(output['hm'], batch['hm'])
    if opt.hm_hp and opt.hm_hp_weight > 0:
        if opt.mse_loss:
            hm_hp_loss = jnp.mean((output['hm_hp'].astype(jnp.float32)
                                   - batch['hm_hp'].astype(jnp.float32)) ** 2)
        else:
            hm_hp_loss = focal_loss(output['hm_hp'], batch['hm_hp'])

    # TODO(synk): dense_hp (L1Loss sum) and reg_loss=='sl1' variants not implemented.
    fused = _fused_ind_losses(opt, output, batch)
    hp_loss = fused['hp_loss']
    wh_loss = fused.get('wh_loss', zero)
    dim_loss = fused.get('dim_loss', zero)
    p3d_loss = fused.get('p3d_loss', zero)
    off_loss = fused.get('off_loss', zero)
    rot_loss = fused.get('rot_loss', zero)

    if opt.reg_hp_offset and opt.off_weight > 0:
        hp_offset_loss = reg_l1_loss(output['hp_offset'], batch['hp_mask'],
                                     batch['hp_ind'], batch['hp_offset'])

    # TODO(synk): AutoShape_Position_loss (camera-geometry pinv/SVD 3D-position
    # estimation) has no provided source and no clean Pallas equivalent; zeros.
    coor_loss, prob_loss, box_score = zero, zero, zero

    loss_stats = {'loss': box_score, 'hm_loss': hm_loss, 'hp_loss': hp_loss,
                  'hm_hp_loss': hm_hp_loss, 'hp_offset_loss': hp_offset_loss,
                  'wh_loss': wh_loss, 'off_loss': off_loss, 'dim_loss': dim_loss,
                  'rot_loss': rot_loss, 'prob_loss': prob_loss, 'box_score': box_score,
                  'coor_loss': coor_loss, 'p3d_loss': p3d_loss}
    return loss_stats, loss_stats


# ----------------------------- pure-JAX reference -----------------------------

def _reference_losses(opt, output, batch):
    f32 = jnp.float32

    def _sigmoid(x):
        return jnp.clip(jax.nn.sigmoid(x.astype(f32)), 1e-4, 1 - 1e-4)

    def _neg_loss(pred, gt):
        gt = gt.astype(f32)
        pos = (gt == 1.0).astype(f32)
        neg = (gt < 1.0).astype(f32)
        negw = (1.0 - gt) ** 4
        pos_l = jnp.log(pred) * (1.0 - pred) ** 2 * pos
        neg_l = jnp.log(1.0 - pred) * pred * pred * negw * neg
        npos = pos.sum()
        return jnp.where(npos == 0, -neg_l.sum(), -(pos_l.sum() + neg_l.sum()) / npos)

    def _gather(feat, ind):
        B, C, H, W = feat.shape
        f = jnp.transpose(feat, (0, 2, 3, 1)).reshape(B, H * W, C).astype(f32)
        return jnp.take_along_axis(f, ind[:, :, None].astype(jnp.int32), axis=1)

    def _reg_l1(feat, mask, ind, tgt):
        pred = _gather(feat, ind)
        m = jnp.broadcast_to(mask.astype(f32)[:, :, None], tgt.shape)
        return jnp.sum(jnp.abs(pred * m - tgt.astype(f32) * m)) / (jnp.sum(m) + 1e-4)

    def _reg_w_l1(feat, mask, ind, tgt):
        pred = _gather(feat, ind)
        m = mask.astype(f32)
        return jnp.sum(jnp.abs(pred * m - tgt.astype(f32) * m)) / (jnp.sum(m) + 1e-4)

    ref = {'hm_loss': _neg_loss(_sigmoid(output['hm']), batch['hm']),
           'hp_loss': _reg_w_l1(output['hps'], batch['hps_mask'], batch['ind'], batch['hps'])}
    if opt.hm_hp and opt.hm_hp_weight > 0:
        if opt.mse_loss:
            ref['hm_hp_loss'] = jnp.mean((output['hm_hp'].astype(f32)
                                          - batch['hm_hp'].astype(f32)) ** 2)
        else:
            ref['hm_hp_loss'] = _neg_loss(_sigmoid(output['hm_hp']), batch['hm_hp'])
    if opt.wh_weight > 0:
        ref['wh_loss'] = _reg_l1(output['wh'], batch['reg_mask'], batch['ind'], batch['wh'])
    if opt.dim_weight > 0:
        ref['dim_loss'] = _reg_l1(output['dim'], batch['reg_mask'], batch['ind'], batch['dim'])
        ref['p3d_loss'] = _reg_l1(output['p3d'], batch['reg_mask'], batch['ind'], batch['p3d'])
    if opt.rot_weight > 0:
        rot_pred = _gather(output['rot'], batch['ind']).reshape(-1, 8)
        ref['rot_loss'] = _compute_rot_loss(rot_pred, batch['rot_mask'],
                                            batch['rotbin'], batch['rotres'])
    if opt.reg_offset and opt.off_weight > 0:
        ref['off_loss'] = _reg_l1(output['reg'], batch['reg_mask'], batch['ind'], batch['reg'])
    if opt.reg_hp_offset and opt.off_weight > 0:
        ref['hp_offset_loss'] = _reg_l1(output['hp_offset'], batch['hp_mask'],
                                        batch['hp_ind'], batch['hp_offset'])
    return ref


# ----------------------------- demo --------------------------------------------

if __name__ == "__main__":
    opt = SimpleNamespace(
        mse_loss=False, dense_hp=False, reg_loss='l1', hm_hp=True,
        wh_weight=0.1, dim_weight=1.0, rot_weight=1.0,
        reg_offset=True, off_weight=1.0, reg_hp_offset=True, hm_hp_weight=1.0,
        dataset='kitti',
    )

    key = jax.random.PRNGKey(0)
    B, H, W = 2, 16, 16
    C_HM, J, K = 3, 9, 8          # classes, keypoints, max objects
    HW = H * W
    ks = list(jax.random.split(key, 24))

    def nrm(k, shape):
        return jax.random.normal(k, shape, dtype=jnp.float32)

    # network head outputs (logits / raw regressions), NCHW
    output = {
        'hm':        nrm(ks[0], (B, C_HM, H, W)),
        'hm_hp':     nrm(ks[1], (B, J, H, W)),
        'hps':       nrm(ks[2], (B, 2 * J, H, W)),
        'wh':        nrm(ks[3], (B, 2, H, W)),
        'dim':       nrm(ks[4], (B, 3, H, W)),
        'p3d':       nrm(ks[5], (B, 24, H, W)),
        'rot':       nrm(ks[6], (B, 8, H, W)),
        'reg':       nrm(ks[7], (B, 2, H, W)),
        'hp_offset': nrm(ks[8], (B, 2, H, W)),
    }

    # ground-truth batch
    hm_gt = jax.random.uniform(ks[9], (B, C_HM, H, W), dtype=jnp.float32) * 0.9
    hm_gt = hm_gt.at[:, :, 4, 4].set(1.0)
    hm_hp_gt = jax.random.uniform(ks[10], (B, J, H, W), dtype=jnp.float32) * 0.9
    hm_hp_gt = hm_hp_gt.at[:, :, 8, 8].set(1.0)

    batch = {
        'hm': hm_gt,
        'hm_hp': hm_hp_gt,
        'ind': jax.random.randint(ks[11], (B, K), 0, HW, dtype=jnp.int32),
        'reg_mask': (jax.random.uniform(ks[12], (B, K)) > 0.4).astype(jnp.float32),
        'rot_mask': (jax.random.uniform(ks[13], (B, K)) > 0.4).astype(jnp.float32),
        'hps': nrm(ks[14], (B, K, 2 * J)),
        'hps_mask': (jax.random.uniform(ks[15], (B, K, 2 * J)) > 0.3).astype(jnp.float32),
        'dep': jax.random.uniform(ks[16], (B, K, 1), minval=1.0, maxval=50.0),
        'wh': nrm(ks[17], (B, K, 2)),
        'dim': nrm(ks[18], (B, K, 3)),
        'p3d': nrm(ks[19], (B, K, 24)),
        'rotbin': jax.random.randint(ks[20], (B, K, 2), 0, 2, dtype=jnp.int32),
        'rotres': nrm(ks[21], (B, K, 2)),
        'reg': jax.random.uniform(ks[22], (B, K, 2)),
        'hp_ind': jax.random.randint(ks[23], (B, K * J), 0, HW, dtype=jnp.int32),
        'hp_mask': (jax.random.uniform(ks[12], (B, K * J)) > 0.4).astype(jnp.float32),
        'hp_offset': jax.random.uniform(ks[14], (B, K * J, 2)),
    }

    loss_stats, _ = autoshape_loss_forward(opt, [output], batch)
    loss_stats = jax.block_until_ready(loss_stats)

    # Verify Pallas results against a pure-JAX reference of the same losses.
    ref = _reference_losses(opt, output, batch)
    for name, val in ref.items():
        got = loss_stats[name]
        if not bool(jnp.allclose(got, val, rtol=2e-3, atol=2e-3)):
            raise AssertionError(
                f"{name}: pallas={float(got):.6f} ref={float(val):.6f}")

    print("KERNEL_OK")
</pallas_src>

<mosaic_0001>
module attributes {stable_mosaic.version = 11 : i64} {
  func.func @_focal_kernel(%arg0: i32, %arg1: memref<8x256xf32, #tpu.memory_space<vmem>>, %arg2: memref<8x256xf32, #tpu.memory_space<vmem>>, %arg3: memref<1x3x256xf32, #tpu.memory_space<vmem>>) attributes {dimension_semantics = [#tpu.dimension_semantics<parallel>], iteration_bounds = array<i64: 1>, scalar_prefetch = 0 : i64, scratch_operands = 0 : i64, tpu.core_type = #tpu.core_type<tc>, window_params = [{transform_indices = @transform_0, window_bounds = array<i64: 8, 256>}, {transform_indices = @transform_1, window_bounds = array<i64: 8, 256>}, {transform_indices = @transform_2, window_bounds = array<i64: 1, 3, 256>}]} {
    %c0 = arith.constant 0 : index
    %c0_0 = arith.constant 0 : index
    %0 = vector.load %arg1[%c0, %c0_0] : memref<8x256xf32, #tpu.memory_space<vmem>>, vector<8x256xf32>
    %c0_1 = arith.constant 0 : index
    %c0_2 = arith.constant 0 : index
    %1 = vector.load %arg2[%c0_1, %c0_2] : memref<8x256xf32, #tpu.memory_space<vmem>>, vector<8x256xf32>
    %2 = arith.negf %0 : vector<8x256xf32>
    %3 = math.exp %2 : vector<8x256xf32>
    %cst = arith.constant 1.000000e+00 : f32
    %4 = vector.broadcast %cst : f32 to vector<8x256xf32>
    %5 = arith.addf %4, %3 : vector<8x256xf32>
    %6 = arith.divf %4, %5 : vector<8x256xf32>
    %cst_3 = arith.constant 9.99999974E-5 : f32
    %cst_4 = arith.constant 0.999899983 : f32
    %7 = vector.broadcast %cst_3 : f32 to vector<8x256xf32>
    %8 = arith.maximumf %7, %6 : vector<8x256xf32>
    %9 = vector.broadcast %cst_4 : f32 to vector<8x256xf32>
    %10 = arith.minimumf %9, %8 : vector<8x256xf32>
    %cst_5 = arith.constant 1.000000e+00 : f32
    %11 = vector.broadcast %cst_5 : f32 to vector<8x256xf32>
    %12 = arith.cmpf oeq, %1, %11 : vector<8x256xf32>
    %13 = arith.extui %12 : vector<8x256xi1> to vector<8x256xi32>
    %14 = arith.sitofp %13 : vector<8x256xi32> to vector<8x256xf32>
    %cst_6 = arith.constant 1.000000e+00 : f32
    %15 = vector.broadcast %cst_6 : f32 to vector<8x256xf32>
    %16 = arith.cmpf olt, %1, %15 : vector<8x256xf32>
    %17 = arith.extui %16 : vector<8x256xi1> to vector<8x256xi32>
    %18 = arith.sitofp %17 : vector<8x256xi32> to vector<8x256xf32>
    %19 = tpu.iota {dimensions = array<i32: 0>} : vector<8x256xi32>
    %c8_i32 = arith.constant 8 : i32
    %20 = arith.muli %arg0, %c8_i32 : i32
    %21 = vector.broadcast %20 : i32 to vector<8x256xi32>
    %22 = arith.addi %19, %21 : vector<8x256xi32>
    %c6_i32 = arith.constant 6 : i32
    %23 = vector.broadcast %c6_i32 : i32 to vector<8x256xi32>
    %24 = arith.cmpi slt, %22, %23 : vector<8x256xi32>
    %25 = arith.extui %24 : vector<8x256xi1> to vector<8x256xi32>
    %26 = arith.sitofp %25 : vector<8x256xi32> to vector<8x256xf32>
    %27 = arith.mulf %14, %26 : vector<8x256xf32>
    %28 = arith.mulf %18, %26 : vector<8x256xf32>
    %29 = math.log %10 : vector<8x256xf32>
    %cst_7 = arith.constant 1.000000e+00 : f32
    %30 = vector.broadcast %cst_7 : f32 to vector<8x256xf32>
    %31 = arith.subf %30, %10 : vector<8x256xf32>
    %32 = arith.mulf %31, %31 : vector<8x256xf32>
    %33 = arith.mulf %29, %32 : vector<8x256xf32>
    %34 = arith.mulf %33, %27 : vector<8x256xf32>
    %cst_8 = arith.constant 1.000000e+00 : f32
    %35 = vector.broadcast %cst_8 : f32 to vector<8x256xf32>
    %36 = arith.subf %35, %10 : vector<8x256xf32>
    %37 = math.log %36 : vector<8x256xf32>
    %38 = arith.mulf %37, %10 : vector<8x256xf32>
    %39 = arith.mulf %38, %10 : vector<8x256xf32>
    %cst_9 = arith.constant 1.000000e+00 : f32
    %40 = vector.broadcast %cst_9 : f32 to vector<8x256xf32>
    %41 = arith.subf %40, %1 : vector<8x256xf32>
    %42 = arith.mulf %41, %41 : vector<8x256xf32>
    %43 = arith.mulf %42, %42 : vector<8x256xf32>
    %44 = arith.mulf %39, %43 : vector<8x256xf32>
    %45 = arith.mulf %44, %28 : vector<8x256xf32>
    %cst_10 = arith.constant dense<0.000000e+00> : vector<256xf32>
    %46 = vector.multi_reduction <add>, %34, %cst_10 [0] : vector<8x256xf32> to vector<256xf32>
    %c0_11 = arith.constant 0 : index
    %c0_12 = arith.constant 0 : index
    %c0_13 = arith.constant 0 : index
    %47 = vector.load %arg3[%c0_11, %c0_12, %c0_13] : memref<1x3x256xf32, #tpu.memory_space<vmem>>, vector<1x1x256xf32>
    %48 = vector.shape_cast %47 : vector<1x1x256xf32> to vector<256xf32>
    %49 = vector.shape_cast %46 : vector<256xf32> to vector<1x1x256xf32>
    tpu.vector_store %arg3[%c0_11, %c0_12, %c0_13], %49 {strides = array<i32>} : memref<1x3x256xf32, #tpu.memory_space<vmem>>, vector<1x1x256xf32>,
    %cst_14 = arith.constant dense<0.000000e+00> : vector<256xf32>
    %50 = vector.multi_reduction <add>, %45, %cst_14 [0] : vector<8x256xf32> to vector<256xf32>
    %c0_15 = arith.constant 0 : index
    %c1 = arith.constant 1 : index
    %c0_16 = arith.constant 0 : index
    %51 = vector.load %arg3[%c0_15, %c1, %c0_16] : memref<1x3x256xf32, #tpu.memory_space<vmem>>, vector<1x1x256xf32>
    %52 = vector.shape_cast %51 : vector<1x1x256xf32> to vector<256xf32>
    %53 = vector.shape_cast %50 : vector<256xf32> to vector<1x1x256xf32>
    tpu.vector_store %arg3[%c0_15, %c1, %c0_16], %53 {strides = array<i32>} : memref<1x3x256xf32, #tpu.memory_space<vmem>>, vector<1x1x256xf32>,
    %cst_17 = arith.constant dense<0.000000e+00> : vector<256xf32>
    %54 = vector.multi_reduction <add>, %27, %cst_17 [0] : vector<8x256xf32> to vector<256xf32>
    %c0_18 = arith.constant 0 : index
    %c2 = arith.constant 2 : index
    %c0_19 = arith.constant 0 : index
    %55 = vector.load %arg3[%c0_18, %c2, %c0_19] : memref<1x3x256xf32, #tpu.memory_space<vmem>>, vector<1x1x256xf32>
    %56 = vector.shape_cast %55 : vector<1x1x256xf32> to vector<256xf32>
    %57 = vector.shape_cast %54 : vector<256xf32> to vector<1x1x256xf32>
    tpu.vector_store %arg3[%c0_18, %c2, %c0_19], %57 {strides = array<i32>} : memref<1x3x256xf32, #tpu.memory_space<vmem>>, vector<1x1x256xf32>,
    return
  }
  func.func @transform_0(%arg0: i32) -> (i32, i32) {
    %c0_i32 = arith.constant 0 : i32
    %c0_i32_0 = arith.constant 0 : i32
    return %arg0, %c0_i32 : i32, i32
  }
  func.func @transform_1(%arg0: i32) -> (i32, i32) {
    %c0_i32 = arith.constant 0 : i32
    %c0_i32_0 = arith.constant 0 : i32
    return %arg0, %c0_i32 : i32, i32
  }
  func.func @transform_2(%arg0: i32) -> (i32, i32, i32) {
    %c0_i32 = arith.constant 0 : i32
    %c0_i32_0 = arith.constant 0 : i32
    %c0_i32_1 = arith.constant 0 : i32
    return %arg0, %c0_i32, %c0_i32_0 : i32, i32, i32
  }
}

</mosaic_0001>

<bundles_post_ra>
// kernel: tpu_custom_call.1
= control target key start
LH: loop header
LB: loop body
LE: loop exit
PB: predicated region body
PF: predicated region fallthrough
CT: control target
= control target key end

     0   :  { %7 = vsyncpa [#allocation3], 0  ;;  %s365_s0 = inlined_call_operand.hbm [shape: f32[8,256], index: 0, kind: input, shape index: {}]   ;;  %s366_s1 = inlined_call_operand.hbm [shape: f32[8,256], index: 1, kind: input, shape index: {}]   ;;  %s367_s2 = inlined_call_operand.vmem [shape: f32[1,3,256], index: 2, kind: output, shape index: {}]  }
   0x1   :  { %8 = vsyncpa [#allocation5], 0  ;;  %s287_s9 = smov [#allocation2]   ;;  %s288_s11 = smov [#allocation4]  }
   0x2   :  { %s15_s10 = sshll.u32 %s287_s9, 4  ;;  %s25_s12 = sshll.u32 %s288_s11, 4  ;;  %s16_s10 = int_to_ptr.vmem [resolvable:$true] %s15_s10  ;;  %s26_s12 = int_to_ptr.vmem [resolvable:$true] %s25_s12 }
   0x3   :  { %s251_s13 = scalar_lea.vmem %s16_s10, 256  ;;  %p256_p1 = scmp.lt.s32.totalorder %s16_s10, %s16_s10 }
   0x4   :  { %p252_p0 = scmp.ne.s32.totalorder %s16_s10, %s251_s13  ;;  %p257_p2 = scmp.lt.s32.totalorder %s251_s13, %s251_s13 }
   0x6   :  { %p258_p3 = por %p257_p2, %p256_p1 }
   0x8   :  { %p259_p4 = pnand %p258_p3, %p252_p0 }
   0xa   :  { %262 = shalt.err (!%p259_p4)
}
   0xb   :  { %18 = dma.hbm_to_vmem [thread:$0]  %s365_s0, 256, %s16_s10, [#allocation3]  }
   0xc   :  { %s271_s16 = scalar_lea.vmem %s26_s12, 256  ;;  %p276_p6 = scmp.lt.s32.totalorder %s26_s12, %s26_s12 }
   0xd   :  { %p272_p5 = scmp.ne.s32.totalorder %s26_s12, %s271_s16  ;;  %p277_p7 = scmp.lt.s32.totalorder %s271_s16, %s271_s16 }
   0xf   :  { %p278_p8 = por %p277_p7, %p276_p6 }
  0x11   :  { %p279_p9 = pnand %p278_p8, %p272_p5 }
  0x13   :  { %282 = shalt.err (!%p279_p9)
}
  0x14   :  { %28 = dma.hbm_to_vmem [thread:$0]  %s366_s1, 256, %s26_s12, [#allocation5]  }
  0x15   :  { %283 = dma.done.wait [#allocation3], 256  }
  0x16   :  { %284 = vsyncadd [#allocation3], 4294967040 }
  0x17   :  { %285 = dma.done.wait [#allocation5], 256  }
  0x18   :  { %286 = vsyncadd [#allocation5], 4294967040  ;;  %v67_v0 = vlaneseq  ;;  %v35_v2 = vld [vmem:[#allocation2] sm:$0xff]  ;;  %v36_v3 = vld [vmem:[#allocation2 + $0x8] sm:$0xff]  ;;  %v289_v5 = vmov 0.0  }
  0x19   :  { %v312_v4 = vld [vmem:[#allocation4] sm:$0xff]  ;;  %v317_v7 = vld [vmem:[#allocation4 + $0x8] sm:$0xff]  ;;  %v214_v8 = vmul.f32 -1.442695, %v35_v2  ;;  %v215_v9 = vmul.f32 -1.442695, %v36_v3 }
  0x1a   :  { %v68_v1 = vshrl.u32 %v67_v0, 7  ;;  %vm55_vm1 = vcmp.eq.f32.partialorder %v312_v4, 1.0  ;;  %vm56_vm2 = vcmp.eq.f32.partialorder %v317_v7, 1.0  ;;  %v290_v16 = vmov 1966171168  }
  0x1b   :  { %v216_v10 = vsel %vm55_vm1, 1.0, %v289_v5  ;;  %227 = vpow2.f32 %v214_v8  ;;  %v217_v11 = vsel %vm56_vm2, 1.0, %v289_v5  ;;  %v125_v17 = vunpack.c.l.s4 %v290_v16 }
  0x1c   :  { %vm72_vm0 = vcmp.lt.s32.totalorder %v68_v1, 6  ;;  %229 = vpow2.f32 %v215_v9  ;;  %vm332_vm3 = vcmp.lt.s32.totalorder %v67_v0, 256  ;;  %v99_v46 = vsub.f32 1.0, %v312_v4 }
  0x1d   :  { %v315_v6 = vsel %vm72_vm0, 1.0, %v289_v5  ;;  %v126_v22 = vunpack.c.0.s8 %v125_v17  ;;  %v100_v47 = vsub.f32 1.0, %v317_v7  ;;  %vm61_vm4 = vcmp.lt.f32.partialorder %v312_v4, 1.0 }
  0x1e   :  { %v75_v12 = vmul.f32 %v315_v6, %v216_v10  ;;  %v325_v13 = vmul.f32 %v315_v6, %v217_v11  ;;  %v101_v53 = vmul.f32 %v99_v46, %v99_v46  ;;  %vm62_vm5 = vcmp.lt.f32.partialorder %v317_v7, 1.0 }
  0x1f   :  { %v329_v28 = vsub.s32 %v126_v22, %v68_v1  ;;  %v102_v56 = vmul.f32 %v100_v47, %v100_v47  ;;  %v218_v60 = vsel %vm61_vm4, 1.0, %v289_v5  ;;  %v219_v63 = vsel %vm62_vm5, 1.0, %v289_v5 }
  0x20   :  { %v176_v14 = vrot.slane %v75_v12, 4  ;;  %v182_v15 = vrot.slane %v325_v13, 4  ;;  %v103_v2 = vmul.f32 %v101_v53, %v101_v53  ;;  %v77_v7 = vmul.f32 %v315_v6, %v218_v60 }
  0x21   :  { %v104_v8 = vmul.f32 %v102_v56, %v102_v56  ;;  %v78_v11 = vmul.f32 %v315_v6, %v219_v63 }
  0x22   :  { %v177_v18 = vadd.f32 %v176_v14, %v75_v12  ;;  %v183_v19 = vadd.f32 %v182_v15, %v325_v13 }
  0x24   :  { %v178_v20 = vrot.slane %v177_v18, 2  ;;  %v184_v21 = vrot.slane %v183_v19, 2 }
  0x26   :  { %v179_v23 = vadd.f32 %v178_v20, %v177_v18  ;;  %v185_v24 = vadd.f32 %v184_v21, %v183_v19 }
  0x28   :  { %v180_v25 = vrot.slane %v179_v23, 1  ;;  %v186_v26 = vrot.slane %v185_v24, 1  ;;  %v228_v27 = vpop.eup %227 }
  0x29   :  { %v230_v31 = vpop.eup %229  ;;  %v45_v32 = vadd.f32 1.0, %v228_v27 }
  0x2a   :  { %v181_v29 = vadd.f32 %v180_v25, %v179_v23  ;;  %v187_v30 = vadd.f32 %v186_v26, %v185_v24  ;;  %v46_v33 = vadd.f32 1.0, %v230_v31 }
  0x2b   :  { %231 = vrcp.f32 %v45_v32 }
  0x2c   :  { %v190_v34 = vcombine.low %v181_v29, %v187_v30  ;;  %233 = vrcp.f32 %v46_v33 }
  0x2e   :  { %v197_v35 = vrot.slane %v190_v34, %v329_v28 }
  0x30   :  { %v204_v37 = vrot.slane %v197_v35, %v329_v28 }
  0x32   :  { %222 = vst.msk [vmem:[%s367_s2 + $0x2] ss:$4 sm:$0x3] %vm332_vm3, %v204_v37 }
  0x38   :  { %v232_v38 = vpop.eup %231 }
  0x39   :  { %v234_v39 = vpop.eup %233  ;;  %v51_v40 = vmax.f32 %v232_v38, 0.0001 }
  0x3a   :  { %v52_v41 = vmax.f32 %v234_v39, 0.0001 }
  0x3b   :  { %v53_v42 = vmin.f32 %v51_v40, 0.9999 }
  0x3c   :  { %v54_v43 = vmin.f32 %v52_v41, 0.9999 }
  0x3d   :  { %235 = vlog2.f32 %v53_v42  ;;  %v83_v44 = vsub.f32 1.0, %v53_v42 }
  0x3e   :  { %237 = vlog2.f32 %v54_v43  ;;  %v84_v45 = vsub.f32 1.0, %v54_v43 }
  0x3f   :  { %239 = vlog2.f32 %v83_v44  ;;  %v85_v48 = vmul.f32 %v83_v44, %v83_v44 }
  0x40   :  { %241 = vlog2.f32 %v84_v45  ;;  %v86_v50 = vmul.f32 %v84_v45, %v84_v45 }
  0x4a   :  { %v236_v49 = vpop.eup %235 }
  0x4b   :  { %v238_v51 = vpop.eup %237  ;;  %v80_v52 = vmul.f32 0.6931472, %v236_v49 }
  0x4c   :  { %v240_v54 = vpop.eup %239  ;;  %v82_v55 = vmul.f32 0.6931472, %v238_v51 }
  0x4d   :  { %v242_v57 = vpop.eup %241  ;;  %v87_v58 = vmul.f32 %v85_v48, %v80_v52  ;;  %v92_v59 = vmul.f32 0.6931472, %v240_v54 }
  0x4e   :  { %v88_v61 = vmul.f32 %v86_v50, %v82_v55  ;;  %v94_v62 = vmul.f32 0.6931472, %v242_v57 }
  0x4f   :  { %v89_v0 = vmul.f32 %v87_v58, %v75_v12  ;;  %v95_v1 = vmul.f32 %v92_v59, %v53_v42 }
  0x50   :  { %v90_v3 = vmul.f32 %v88_v61, %v325_v13  ;;  %v96_v4 = vmul.f32 %v94_v62, %v54_v43 }
  0x51   :  { %v97_v9 = vmul.f32 %v95_v1, %v53_v42  ;;  %v109_v10 = vrot.slane %v89_v0, 4 }
  0x52   :  { %v98_v14 = vmul.f32 %v96_v4, %v54_v43  ;;  %v115_v15 = vrot.slane %v90_v3, 4 }
  0x53   :  { %v105_v16 = vmul.f32 %v103_v2, %v97_v9  ;;  %v110_v17 = vadd.f32 %v109_v10, %v89_v0 }
  0x54   :  { %v106_v18 = vmul.f32 %v104_v8, %v98_v14  ;;  %v116_v19 = vadd.f32 %v115_v15, %v90_v3 }
  0x55   :  { %v107_v5 = vmul.f32 %v105_v16, %v77_v7  ;;  %v111_v12 = vrot.slane %v110_v17, 2 }
  0x56   :  { %v108_v20 = vmul.f32 %v106_v18, %v78_v11  ;;  %v117_v21 = vrot.slane %v116_v19, 2 }
  0x57   :  { %v112_v22 = vadd.f32 %v111_v12, %v110_v17  ;;  %v144_v13 = vrot.slane %v107_v5, 4 }
  0x58   :  { %v118_v23 = vadd.f32 %v117_v21, %v116_v19  ;;  %v150_v24 = vrot.slane %v108_v20, 4 }
  0x59   :  { %v113_v25 = vrot.slane %v112_v22, 1  ;;  %v145_v26 = vadd.f32 %v144_v13, %v107_v5 }
  0x5a   :  { %v119_v27 = vrot.slane %v118_v23, 1  ;;  %v151_v29 = vadd.f32 %v150_v24, %v108_v20 }
  0x5b   :  { %v114_v30 = vadd.f32 %v113_v25, %v112_v22  ;;  %v146_v6 = vrot.slane %v145_v26, 2 }
  0x5c   :  { %v120_v31 = vadd.f32 %v119_v27, %v118_v23  ;;  %v152_v32 = vrot.slane %v151_v29, 2 }
  0x5d   :  { %v147_v33 = vadd.f32 %v146_v6, %v145_v26 }
  0x5e   :  { %v123_v34 = vcombine.low %v114_v30, %v120_v31  ;;  %v153_v35 = vadd.f32 %v152_v32, %v151_v29 }
  0x5f   :  { %v148_v37 = vrot.slane %v147_v33, 1 }
  0x60   :  { %v130_v38 = vrot.slane %v123_v34, %v329_v28  ;;  %v154_v39 = vrot.slane %v153_v35, 1 }
  0x61   :  { %v149_v40 = vadd.f32 %v148_v37, %v147_v33 }
  0x62   :  { %v137_v41 = vrot.slane %v130_v38, %v329_v28  ;;  %v155_v42 = vadd.f32 %v154_v39, %v153_v35 }
  0x64   :  { %143 = vst.msk [vmem:[%s367_s2] ss:$4 sm:$0x3] %vm332_vm3, %v137_v41  ;;  %v158_v43 = vcombine.low %v149_v40, %v155_v42 }
  0x66   :  { %v165_v44 = vrot.slane %v158_v43, %v329_v28 }
  0x68   :  { %v172_v45 = vrot.slane %v165_v44, %v329_v28 }
  0x6a   :  { %221 = vst.msk [vmem:[%s367_s2 + $0x1] ss:$4 sm:$0x3] %vm332_vm3, %v172_v45 }
  0x6b   :  { %212 = vsyncpa [#allocation3], 1 }
  0x6c   :  { %213 = vsyncpa [#allocation5], 1 }

</bundles_post_ra>
